<compile_context>
chip_gen: v7x
topology: tpu7x:2x2x1
jax: 0.10.0
libtpu: 0.0.40
codegen_flags: <defaults>
</compile_context>

<pallas_src>
import functools
import math

import jax
import jax.numpy as jnp
from jax import lax
from jax.experimental import pallas as pl
from jax.experimental.pallas import tpu as pltpu

# MXU-operand / inter-kernel activation dtype.  Accumulation & epilogues stay f32.
_COMPUTE_DTYPE = jnp.bfloat16
_LN_EPS = 1e-6


@functools.lru_cache(maxsize=None)
def _vmem_limit_bytes():
    """Scoped-VMEM budget derived from the actual chip (v5e/v6e: ~96-100MiB, v7x: 48MiB)."""
    try:
        cap = int(pltpu.get_tpu_info().vmem_capacity_bytes)
    except Exception:
        cap = 64 * 1024 * 1024  # conservative fallback (v7x-sized)
    return int(min((cap * 3) // 4, 100 * 1024 * 1024))


def _compiler_params(dims):
    return pltpu.CompilerParams(dimension_semantics=dims,
                                vmem_limit_bytes=_vmem_limit_bytes())


def _round_up(x, m):
    return ((x + m - 1) // m) * m


def _row_tiling(M, pref=256):
    """Row-tile size (sublane aligned) + padded row count; works for any M (cdiv+pad)."""
    tm = min(pref, _round_up(M, 8))
    return tm, _round_up(M, tm)


def _pad_rows(x, m_pad):
    M = x.shape[0]
    return x if m_pad == M else jnp.pad(x, ((0, m_pad - M), (0, 0)))


def _layernorm(y, g, b, eps=_LN_EPS):
    """f32 LayerNorm over the (full) last dim, biased variance (matches torch eps=1e-6)."""
    mean = jnp.mean(y, axis=-1, keepdims=True)
    var = jnp.mean(jnp.square(y - mean), axis=-1, keepdims=True)
    return (y - mean) * lax.rsqrt(var + eps) * g.astype(jnp.float32) + b.astype(jnp.float32)


# --------------------- input projection + LayerNorm (fused) ---------------------

def _proj_ln_kernel(x_ref, w_ref, b_ref, g_ref, be_ref, o_ref):
    y = jnp.dot(x_ref[...], w_ref[...], preferred_element_type=jnp.float32)
    y = y + b_ref[...].astype(jnp.float32)
    o_ref[...] = _layernorm(y, g_ref[...], be_ref[...]).astype(o_ref.dtype)


def proj_layernorm(x, w, b, gamma, beta, tm=256):
    """LayerNorm(x @ w + b).  Row-tiled; K and the LN feature axis stay whole."""
    M, K = x.shape
    N = w.shape[1]
    tm, m_pad = _row_tiling(M, tm)
    xp = _pad_rows(x, m_pad)
    out = pl.pallas_call(
        _proj_ln_kernel,
        out_shape=jax.ShapeDtypeStruct((m_pad, N), x.dtype),
        grid=(m_pad // tm,),
        in_specs=[
            pl.BlockSpec((tm, K), lambda i: (i, 0)),
            pl.BlockSpec((K, N), lambda i: (0, 0)),
            pl.BlockSpec((1, N), lambda i: (0, 0)),
            pl.BlockSpec((1, N), lambda i: (0, 0)),
            pl.BlockSpec((1, N), lambda i: (0, 0)),
        ],
        out_specs=pl.BlockSpec((tm, N), lambda i: (i, 0)),
        compiler_params=_compiler_params(("parallel",)),
    )(xp, w, b, gamma, beta)
    return out if m_pad == M else out[:M]


# ---------- fused attention block: QKV + attention + W_o + residual + LN ----------

def _attn_block_kernel(x_ref, wq_ref, wk_ref, wv_ref, wo_ref, g_ref, be_ref, o_ref,
                       *, n_head, d_k, d_v):
    x = x_ref[0]                                                   # (L, D) bf16
    # Three separate projections: each head group starts at lane 0 (no lane slicing
    # at all for n_head=1).  Softmax scale is already folded into wq.
    q = jnp.dot(x, wq_ref[...], preferred_element_type=jnp.float32)   # (L, H*dk) f32
    k = jnp.dot(x, wk_ref[...], preferred_element_type=jnp.float32)
    v = jnp.dot(x, wv_ref[...], preferred_element_type=jnp.float32)

    heads = []
    for h in range(n_head):                                        # static; n_head=1 here
        qh = q[:, h * d_k:(h + 1) * d_k].astype(x.dtype)
        kh = k[:, h * d_k:(h + 1) * d_k].astype(x.dtype)
        vh = v[:, h * d_v:(h + 1) * d_v].astype(x.dtype)
        # contract d_k directly (no k.T -> no XLU transpose before the MXU)
        s = lax.dot_general(qh, kh, (((1,), (1,)), ((), ())),
                            preferred_element_type=jnp.float32)    # (L, L) f32
        m = jnp.max(s, axis=-1, keepdims=True)
        p = jnp.exp(s - m)
        denom = jnp.sum(p, axis=-1, keepdims=True)
        # approx reciprocal -> EUP, not VALU divide (tiny documented softmax deviation)
        attn = (p * pl.reciprocal(denom, approx=True)).astype(x.dtype)
        heads.append(jnp.dot(attn, vh, preferred_element_type=jnp.float32))
    attn_out = heads[0] if n_head == 1 else jnp.concatenate(heads, axis=-1)

    y = jnp.dot(attn_out.astype(x.dtype), wo_ref[...],
                preferred_element_type=jnp.float32)                # (L, D) f32
    y = y + x.astype(jnp.float32)                                  # residual
    o_ref[0] = _layernorm(y, g_ref[...], be_ref[...]).astype(o_ref.dtype)


def attention_block(x, wq, wk, wv, wo, gamma, beta, *, n_head, d_k, d_v):
    """x: (B, L, D) -> LayerNorm(attention(x) @ w_o + x); one kernel per batch element."""
    B, L, D = x.shape
    kern = functools.partial(_attn_block_kernel, n_head=n_head, d_k=d_k, d_v=d_v)
    return pl.pallas_call(
        kern,
        out_shape=jax.ShapeDtypeStruct((B, L, D), x.dtype),
        grid=(B,),
        in_specs=[
            pl.BlockSpec((1, L, D), lambda b: (b, 0, 0)),
            pl.BlockSpec((D, n_head * d_k), lambda b: (0, 0)),
            pl.BlockSpec((D, n_head * d_k), lambda b: (0, 0)),
            pl.BlockSpec((D, n_head * d_v), lambda b: (0, 0)),
            pl.BlockSpec((n_head * d_v, D), lambda b: (0, 0)),
            pl.BlockSpec((1, D), lambda b: (0, 0)),
            pl.BlockSpec((1, D), lambda b: (0, 0)),
        ],
        out_specs=pl.BlockSpec((1, L, D), lambda b: (b, 0, 0)),
        compiler_params=_compiler_params(("parallel",)),
    )(x, wq, wk, wv, wo, gamma, beta)


# ------------- fused FFN block: Linear+ReLU -> Linear + residual + LN -------------

def _ffn_block_kernel(x_ref, w1_ref, b1_ref, w2_ref, b2_ref, g_ref, be_ref, o_ref):
    x = x_ref[...]                                                 # (tm, D) bf16
    h = jnp.dot(x, w1_ref[...], preferred_element_type=jnp.float32)
    h = jnp.maximum(h + b1_ref[...].astype(jnp.float32), 0.0)
    y = jnp.dot(h.astype(x.dtype), w2_ref[...], preferred_element_type=jnp.float32)
    y = y + b2_ref[...].astype(jnp.float32) + x.astype(jnp.float32)
    o_ref[...] = _layernorm(y, g_ref[...], be_ref[...]).astype(o_ref.dtype)


def ffn_block(x, w1, b1, w2, b2, gamma, beta, tm=256):
    M, D = x.shape
    d_inner = w1.shape[1]
    tm, m_pad = _row_tiling(M, tm)
    xp = _pad_rows(x, m_pad)
    out = pl.pallas_call(
        _ffn_block_kernel,
        out_shape=jax.ShapeDtypeStruct((m_pad, D), x.dtype),
        grid=(m_pad // tm,),
        in_specs=[
            pl.BlockSpec((tm, D), lambda i: (i, 0)),
            pl.BlockSpec((D, d_inner), lambda i: (0, 0)),
            pl.BlockSpec((1, d_inner), lambda i: (0, 0)),
            pl.BlockSpec((d_inner, D), lambda i: (0, 0)),
            pl.BlockSpec((1, D), lambda i: (0, 0)),
            pl.BlockSpec((1, D), lambda i: (0, 0)),
            pl.BlockSpec((1, D), lambda i: (0, 0)),
        ],
        out_specs=pl.BlockSpec((tm, D), lambda i: (i, 0)),
        compiler_params=_compiler_params(("parallel",)),
    )(xp, w1, b1, w2, b2, gamma, beta)
    return out if m_pad == M else out[:M]


# ----------------------------- fused score head -----------------------------

def _score_kernel(x_ref, w1_ref, b1_ref, w2r_ref, b2_ref, o_ref):
    h = jnp.dot(x_ref[...], w1_ref[...], preferred_element_type=jnp.float32)
    h = jnp.maximum(h + b1_ref[...].astype(jnp.float32), 0.0)
    # Final d_model->1 projection expressed as (1, D) x (tm, D)^T so the result is a
    # lane-dense (1, tm) row -> one full-width store instead of (tm, 1) masked stores.
    s = lax.dot_general(w2r_ref[...].astype(jnp.float32), h,
                        (((1,), (1,)), ((), ())),
                        preferred_element_type=jnp.float32)        # (1, tm)
    o_ref[...] = jax.nn.sigmoid(s + b2_ref[...].astype(jnp.float32)).astype(o_ref.dtype)


def score_head(x, w1, b1, w2_row, b2, tm=256):
    """Fused Linear -> ReLU -> Linear(->1) -> Sigmoid.  x: (M, D) -> (M,) in f32."""
    M, D = x.shape
    N1 = w1.shape[1]
    tm, m_pad = _row_tiling(M, tm)
    xp = _pad_rows(x, m_pad)
    out = pl.pallas_call(
        _score_kernel,
        out_shape=jax.ShapeDtypeStruct((1, m_pad), jnp.float32),
        grid=(m_pad // tm,),
        in_specs=[
            pl.BlockSpec((tm, D), lambda i: (i, 0)),
            pl.BlockSpec((D, N1), lambda i: (0, 0)),
            pl.BlockSpec((1, N1), lambda i: (0, 0)),
            pl.BlockSpec((1, N1), lambda i: (0, 0)),
            pl.BlockSpec((1, 1), lambda i: (0, 0)),
        ],
        out_specs=pl.BlockSpec((1, tm), lambda i: (0, i)),
        compiler_params=_compiler_params(("parallel",)),
    )(xp, w1, b1, w2_row, b2)
    return out[0, :M]


# ----------------------------- model glue -----------------------------

def encoder_layer(x, p, *, n_head, d_k, d_v):
    """Post-norm encoder layer: 2 fused pallas_calls (attention block + FFN block)."""
    B, L, D = x.shape
    x = attention_block(x, p["w_q"], p["w_k"], p["w_v"], p["w_o"],
                        p["ln_attn_g"], p["ln_attn_b"],
                        n_head=n_head, d_k=d_k, d_v=d_v)
    y = ffn_block(x.reshape(B * L, D), p["ffn_w1"], p["ffn_b1"],
                  p["ffn_w2"], p["ffn_b2"], p["ln_ffn_g"], p["ln_ffn_b"])
    return y.reshape(B, L, D)


def transformer_encoder(src_seq, fp, *, n_head, d_k, d_v):
    B, L, Din = src_seq.shape
    x2 = proj_layernorm(src_seq.reshape(B * L, Din).astype(_COMPUTE_DTYPE),
                        fp["proj_w"], fp["proj_b"], fp["ln_g"], fp["ln_b"])
    D = x2.shape[1]
    x = x2.reshape(B, L, D)

    for p in fp["layers"]:
        x = encoder_layer(x, p, n_head=n_head, d_k=d_k, d_v=d_v)

    # .detach() is identity in the forward pass
    u = encoder_layer(lax.stop_gradient(x), fp["unq_est"],
                      n_head=n_head, d_k=d_k, d_v=d_v)
    scores = score_head(u.reshape(B * L, D), fp["score1_w"], fp["score1_b"],
                        fp["score2_wrow"], fp["score2_b"])
    return x, scores.reshape(B, L)                                 # == scores.squeeze(-1)


# ------------------- parameter init + one-time preprocessing -------------------

def init_linear(key, d_in, d_out, bias=True):
    kw, kb = jax.random.split(key)
    bound = 1.0 / math.sqrt(d_in)
    w = jax.random.uniform(kw, (d_in, d_out), jnp.float32, -bound, bound)
    b = (jax.random.uniform(kb, (d_out,), jnp.float32, -bound, bound)
         if bias else jnp.zeros((d_out,), jnp.float32))
    return (w, b)


def init_encoder_layer(key, d_model, d_inner, n_head, d_k, d_v):
    ks = jax.random.split(key, 6)
    ones, zeros = jnp.ones((d_model,), jnp.float32), jnp.zeros((d_model,), jnp.float32)
    return dict(
        w_q=init_linear(ks[0], d_model, n_head * d_k, bias=False),
        w_k=init_linear(ks[1], d_model, n_head * d_k, bias=False),
        w_v=init_linear(ks[2], d_model, n_head * d_v, bias=False),
        w_o=init_linear(ks[3], n_head * d_v, d_model, bias=False),
        ln_attn=(ones, zeros),
        ffn_w1=init_linear(ks[4], d_model, d_inner),
        ffn_w2=init_linear(ks[5], d_inner, d_model),
        ln_ffn=(ones, zeros),
    )


def init_params(key, *, d_inp, n_layers, n_head, d_k, d_v, d_model, d_inner):
    ks = jax.random.split(key, n_layers + 4)
    return dict(
        proj=init_linear(ks[0], d_inp, d_model),
        ln=(jnp.ones((d_model,), jnp.float32), jnp.zeros((d_model,), jnp.float32)),
        layers=[init_encoder_layer(ks[1 + i], d_model, d_inner, n_head, d_k, d_v)
                for i in range(n_layers)],
        unq_est=init_encoder_layer(ks[n_layers + 1], d_model, d_inner, n_head, d_k, d_v),
        score1=init_linear(ks[n_layers + 2], d_model, d_model),
        score2=init_linear(ks[n_layers + 3], d_model, 1),
    )


def prepare_params(params, *, d_k):
    """One-time preprocessing (hoisted out of the traced forward): fold 1/sqrt(d_k)
    into w_q in f32 (single rounding), reshape biases / LN params to (1, N) rows,
    and cast everything to the bf16 compute dtype."""
    c = lambda a: a.astype(_COMPUTE_DTYPE)
    row = lambda a: c(a.reshape(1, -1))
    scale = 1.0 / math.sqrt(d_k)

    def layer(p):
        return dict(
            w_q=c(p["w_q"][0] * scale), w_k=c(p["w_k"][0]), w_v=c(p["w_v"][0]),
            w_o=c(p["w_o"][0]),
            ln_attn_g=row(p["ln_attn"][0]), ln_attn_b=row(p["ln_attn"][1]),
            ffn_w1=c(p["ffn_w1"][0]), ffn_b1=row(p["ffn_w1"][1]),
            ffn_w2=c(p["ffn_w2"][0]), ffn_b2=row(p["ffn_w2"][1]),
            ln_ffn_g=row(p["ln_ffn"][0]), ln_ffn_b=row(p["ln_ffn"][1]),
        )

    return dict(
        proj_w=c(params["proj"][0]), proj_b=row(params["proj"][1]),
        ln_g=row(params["ln"][0]), ln_b=row(params["ln"][1]),
        layers=[layer(p) for p in params["layers"]],
        unq_est=layer(params["unq_est"]),
        score1_w=c(params["score1"][0]), score1_b=row(params["score1"][1]),
        score2_wrow=c(params["score2"][0].reshape(1, -1)),   # (D,1) column -> (1,D) row
        score2_b=c(params["score2"][1].reshape(1, 1)),
    )


# ----------------------------- pure-JAX reference -----------------------------

def ref_forward(src, params, *, n_head, d_k, d_v):
    """f32-math reference on the same (bf16-valued) weights/inputs."""
    params = jax.tree_util.tree_map(lambda a: a.astype(jnp.float32), params)
    src = src.astype(jnp.float32)

    def lin(x, wb):
        w, b = wb
        return x @ w + b

    def ln(x, gb, eps=_LN_EPS):
        g, b = gb
        m = x.mean(-1, keepdims=True)
        v = ((x - m) ** 2).mean(-1, keepdims=True)
        return (x - m) / jnp.sqrt(v + eps) * g + b

    def enc_layer(x, p):
        B, L, Dm = x.shape
        q = lin(x, p["w_q"]).reshape(B, L, n_head, d_k).transpose(0, 2, 1, 3)
        k = lin(x, p["w_k"]).reshape(B, L, n_head, d_k).transpose(0, 2, 1, 3)
        v = lin(x, p["w_v"]).reshape(B, L, n_head, d_v).transpose(0, 2, 1, 3)
        s = jnp.einsum("bhqd,bhkd->bhqk", q, k) / math.sqrt(d_k)
        a = jax.nn.softmax(s, axis=-1)
        o = jnp.einsum("bhqk,bhkd->bhqd", a, v).transpose(0, 2, 1, 3).reshape(B, L, n_head * d_v)
        x = ln(lin(o, p["w_o"]) + x, p["ln_attn"])
        f = lin(jax.nn.relu(lin(x, p["ffn_w1"])), p["ffn_w2"])
        return ln(f + x, p["ln_ffn"])

    x = ln(lin(src, params["proj"]), params["ln"])
    for p in params["layers"]:
        x = enc_layer(x, p)
    u = enc_layer(x, params["unq_est"])
    h = jax.nn.relu(lin(u, params["score1"]))
    s = jax.nn.sigmoid(lin(h, params["score2"]))
    return x, s.squeeze(-1)


# ----------------------------- main -----------------------------

if __name__ == "__main__":
    # Small, module-consistent shapes (scaled-down d_inp/d_model/etc.)
    cfg = dict(d_inp=64, n_layers=2, n_head=1, d_k=16, d_v=16, d_model=32, d_inner=64)
    B, N = 2, 8

    key = jax.random.PRNGKey(0)
    kp, kx = jax.random.split(key)
    params = init_params(kp, **cfg)                                   # f32 master params
    fast = prepare_params(params, d_k=cfg["d_k"])                     # bf16 kernel params
    params_bf16 = jax.tree_util.tree_map(lambda a: a.astype(jnp.bfloat16), params)

    src_seq = jax.random.normal(kx, (B, N, cfg["d_inp"]), jnp.float32)
    src_bf16 = src_seq.astype(jnp.bfloat16)

    fwd = jax.jit(functools.partial(transformer_encoder,
                                    n_head=cfg["n_head"], d_k=cfg["d_k"], d_v=cfg["d_v"]))
    enc_out, scores = fwd(src_bf16, fast)
    jax.block_until_ready((enc_out, scores))

    ref_out, ref_scores = ref_forward(src_bf16, params_bf16,
                                      n_head=cfg["n_head"], d_k=cfg["d_k"], d_v=cfg["d_v"])

    assert enc_out.shape == (B, N, cfg["d_model"]), enc_out.shape
    assert scores.shape == (B, N), scores.shape
    assert jnp.isfinite(enc_out.astype(jnp.float32)).all() and jnp.isfinite(scores).all()
    err_enc = float(jnp.max(jnp.abs(enc_out.astype(jnp.float32) - ref_out)))
    err_sco = float(jnp.max(jnp.abs(scores - ref_scores)))
    # Tolerances reflect bf16 inter-kernel activations + approx softmax reciprocal
    # vs the f32-math reference (~2% of the ~±3.5 LayerNorm output range).
    assert err_enc < 1.5e-1 and err_sco < 7.5e-2, (err_enc, err_sco)

    print("KERNEL_OK")
</pallas_src>

<mosaic_0001>
module attributes {stable_mosaic.version = 11 : i64} {
  func.func @_proj_ln_kernel(%arg0: i32, %arg1: memref<16x64xbf16, #tpu.memory_space<vmem>>, %arg2: memref<64x32xbf16, #tpu.memory_space<vmem>>, %arg3: memref<1x32xbf16, #tpu.memory_space<vmem>>, %arg4: memref<1x32xbf16, #tpu.memory_space<vmem>>, %arg5: memref<1x32xbf16, #tpu.memory_space<vmem>>, %arg6: memref<16x32xbf16, #tpu.memory_space<vmem>>) attributes {dimension_semantics = [#tpu.dimension_semantics<parallel>], iteration_bounds = array<i64: 1>, scalar_prefetch = 0 : i64, scratch_operands = 0 : i64, tpu.core_type = #tpu.core_type<tc>, window_params = [{transform_indices = @transform_0, window_bounds = array<i64: 16, 64>}, {pipeline_mode = #tpu.pipeline_mode<synchronous>, transform_indices = @transform_1, window_bounds = array<i64: 64, 32>}, {pipeline_mode = #tpu.pipeline_mode<synchronous>, transform_indices = @transform_2, window_bounds = array<i64: 1, 32>}, {pipeline_mode = #tpu.pipeline_mode<synchronous>, transform_indices = @transform_3, window_bounds = array<i64: 1, 32>}, {pipeline_mode = #tpu.pipeline_mode<synchronous>, transform_indices = @transform_4, window_bounds = array<i64: 1, 32>}, {transform_indices = @transform_5, window_bounds = array<i64: 16, 32>}]} {
    %c0 = arith.constant 0 : index
    %c0_0 = arith.constant 0 : index
    %0 = vector.load %arg1[%c0, %c0_0] : memref<16x64xbf16, #tpu.memory_space<vmem>>, vector<16x64xbf16>
    %c0_1 = arith.constant 0 : index
    %c0_2 = arith.constant 0 : index
    %1 = vector.load %arg2[%c0_1, %c0_2] : memref<64x32xbf16, #tpu.memory_space<vmem>>, vector<64x32xbf16>
    %cst = arith.constant dense<0.000000e+00> : vector<16x32xf32>
    %2 = tpu.matmul %0, %1, %cst {dimension_numbers = #tpu.dot_dimension_numbers<[1], [0], [0], [1], [0, 0, 1, 1], [], []>} : vector<16x64xbf16>, vector<64x32xbf16>, vector<16x32xf32> -> vector<16x32xf32>
    %c0_3 = arith.constant 0 : index
    %c0_4 = arith.constant 0 : index
    %3 = vector.load %arg3[%c0_3, %c0_4] : memref<1x32xbf16, #tpu.memory_space<vmem>>, vector<1x32xbf16>
    %4 = arith.extf %3 : vector<1x32xbf16> to vector<1x32xf32>
    %5 = vector.broadcast %4 : vector<1x32xf32> to vector<16x32xf32>
    %6 = arith.addf %2, %5 : vector<16x32xf32>
    %c0_5 = arith.constant 0 : index
    %c0_6 = arith.constant 0 : index
    %7 = vector.load %arg4[%c0_5, %c0_6] : memref<1x32xbf16, #tpu.memory_space<vmem>>, vector<1x32xbf16>
    %c0_7 = arith.constant 0 : index
    %c0_8 = arith.constant 0 : index
    %8 = vector.load %arg5[%c0_7, %c0_8] : memref<1x32xbf16, #tpu.memory_space<vmem>>, vector<1x32xbf16>
    %cst_9 = arith.constant dense<0.000000e+00> : vector<16xf32>
    %9 = vector.multi_reduction <add>, %6, %cst_9 [1] : vector<16x32xf32> to vector<16xf32>
    %10 = vector.shape_cast %9 : vector<16xf32> to vector<16x1xf32>
    %cst_10 = arith.constant 3.200000e+01 : f32
    %11 = vector.broadcast %cst_10 : f32 to vector<16x1xf32>
    %12 = arith.divf %10, %11 : vector<16x1xf32>
    %13 = vector.broadcast %12 : vector<16x1xf32> to vector<16x32xf32>
    %14 = arith.subf %6, %13 : vector<16x32xf32>
    %15 = arith.mulf %14, %14 : vector<16x32xf32>
    %cst_11 = arith.constant dense<0.000000e+00> : vector<16xf32>
    %16 = vector.multi_reduction <add>, %15, %cst_11 [1] : vector<16x32xf32> to vector<16xf32>
    %17 = vector.shape_cast %16 : vector<16xf32> to vector<16x1xf32>
    %cst_12 = arith.constant 3.200000e+01 : f32
    %18 = vector.broadcast %cst_12 : f32 to vector<16x1xf32>
    %19 = arith.divf %17, %18 : vector<16x1xf32>
    %20 = vector.broadcast %12 : vector<16x1xf32> to vector<16x32xf32>
    %21 = arith.subf %6, %20 : vector<16x32xf32>
    %cst_13 = arith.constant 9.99999997E-7 : f32
    %22 = vector.broadcast %cst_13 : f32 to vector<16x1xf32>
    %23 = arith.addf %19, %22 : vector<16x1xf32>
    %24 = math.rsqrt %23 : vector<16x1xf32>
    %25 = vector.broadcast %24 : vector<16x1xf32> to vector<16x32xf32>
    %26 = arith.mulf %21, %25 : vector<16x32xf32>
    %27 = arith.extf %7 : vector<1x32xbf16> to vector<1x32xf32>
    %28 = vector.broadcast %27 : vector<1x32xf32> to vector<16x32xf32>
    %29 = arith.mulf %26, %28 : vector<16x32xf32>
    %30 = arith.extf %8 : vector<1x32xbf16> to vector<1x32xf32>
    %31 = vector.broadcast %30 : vector<1x32xf32> to vector<16x32xf32>
    %32 = arith.addf %29, %31 : vector<16x32xf32>
    %33 = arith.truncf %32 : vector<16x32xf32> to vector<16x32xbf16>
    %c0_14 = arith.constant 0 : index
    %c0_15 = arith.constant 0 : index
    %34 = vector.load %arg6[%c0_14, %c0_15] : memref<16x32xbf16, #tpu.memory_space<vmem>>, vector<16x32xbf16>
    tpu.vector_store %arg6[%c0_14, %c0_15], %33 {strides = array<i32>} : memref<16x32xbf16, #tpu.memory_space<vmem>>, vector<16x32xbf16>,
    return
  }
  func.func @transform_0(%arg0: i32) -> (i32, i32) {
    %c0_i32 = arith.constant 0 : i32
    %c0_i32_0 = arith.constant 0 : i32
    return %arg0, %c0_i32 : i32, i32
  }
  func.func @transform_1(%arg0: i32) -> (i32, i32) {
    %c0_i32 = arith.constant 0 : i32
    %c0_i32_0 = arith.constant 0 : i32
    %c0_i32_1 = arith.constant 0 : i32
    return %c0_i32, %c0_i32_0 : i32, i32
  }
  func.func @transform_2(%arg0: i32) -> (i32, i32) {
    %c0_i32 = arith.constant 0 : i32
    %c0_i32_0 = arith.constant 0 : i32
    %c0_i32_1 = arith.constant 0 : i32
    return %c0_i32, %c0_i32_0 : i32, i32
  }
  func.func @transform_3(%arg0: i32) -> (i32, i32) {
    %c0_i32 = arith.constant 0 : i32
    %c0_i32_0 = arith.constant 0 : i32
    %c0_i32_1 = arith.constant 0 : i32
    return %c0_i32, %c0_i32_0 : i32, i32
  }
  func.func @transform_4(%arg0: i32) -> (i32, i32) {
    %c0_i32 = arith.constant 0 : i32
    %c0_i32_0 = arith.constant 0 : i32
    %c0_i32_1 = arith.constant 0 : i32
    return %c0_i32, %c0_i32_0 : i32, i32
  }
  func.func @transform_5(%arg0: i32) -> (i32, i32) {
    %c0_i32 = arith.constant 0 : i32
    %c0_i32_0 = arith.constant 0 : i32
    return %arg0, %c0_i32 : i32, i32
  }
}

module attributes {stable_mosaic.version = 11 : i64} {
  func.func @_attn_block_kernel(%arg0: i32, %arg1: memref<1x8x32xbf16, #tpu.memory_space<vmem>>, %arg2: memref<32x16xbf16, #tpu.memory_space<vmem>>, %arg3: memref<32x16xbf16, #tpu.memory_space<vmem>>, %arg4: memref<32x16xbf16, #tpu.memory_space<vmem>>, %arg5: memref<16x32xbf16, #tpu.memory_space<vmem>>, %arg6: memref<1x32xbf16, #tpu.memory_space<vmem>>, %arg7: memref<1x32xbf16, #tpu.memory_space<vmem>>, %arg8: memref<1x8x32xbf16, #tpu.memory_space<vmem>>) attributes {dimension_semantics = [#tpu.dimension_semantics<parallel>], iteration_bounds = array<i64: 2>, scalar_prefetch = 0 : i64, scratch_operands = 0 : i64, tpu.core_type = #tpu.core_type<tc>, window_params = [{transform_indices = @transform_0, window_bounds = array<i64: 1, 8, 32>}, {pipeline_mode = #tpu.pipeline_mode<synchronous>, transform_indices = @transform_1, window_bounds = array<i64: 32, 16>}, {pipeline_mode = #tpu.pipeline_mode<synchronous>, transform_indices = @transform_2, window_bounds = array<i64: 32, 16>}, {pipeline_mode = #tpu.pipeline_mode<synchronous>, transform_indices = @transform_3, window_bounds = array<i64: 32, 16>}, {pipeline_mode = #tpu.pipeline_mode<synchronous>, transform_indices = @transform_4, window_bounds = array<i64: 16, 32>}, {pipeline_mode = #tpu.pipeline_mode<synchronous>, transform_indices = @transform_5, window_bounds = array<i64: 1, 32>}, {pipeline_mode = #tpu.pipeline_mode<synchronous>, transform_indices = @transform_6, window_bounds = array<i64: 1, 32>}, {transform_indices = @transform_7, window_bounds = array<i64: 1, 8, 32>}]} {
    %c0 = arith.constant 0 : index
    %c0_0 = arith.constant 0 : index
    %c0_1 = arith.constant 0 : index
    %0 = vector.load %arg1[%c0, %c0_0, %c0_1] : memref<1x8x32xbf16, #tpu.memory_space<vmem>>, vector<1x8x32xbf16>
    %1 = vector.shape_cast %0 : vector<1x8x32xbf16> to vector<8x32xbf16>
    %c0_2 = arith.constant 0 : index
    %c0_3 = arith.constant 0 : index
    %2 = vector.load %arg2[%c0_2, %c0_3] : memref<32x16xbf16, #tpu.memory_space<vmem>>, vector<32x16xbf16>
    %cst = arith.constant dense<0.000000e+00> : vector<8x16xf32>
    %3 = tpu.matmul %1, %2, %cst {dimension_numbers = #tpu.dot_dimension_numbers<[1], [0], [0], [1], [0, 0, 1, 1], [], []>} : vector<8x32xbf16>, vector<32x16xbf16>, vector<8x16xf32> -> vector<8x16xf32>
    %c0_4 = arith.constant 0 : index
    %c0_5 = arith.constant 0 : index
    %4 = vector.load %arg3[%c0_4, %c0_5] : memref<32x16xbf16, #tpu.memory_space<vmem>>, vector<32x16xbf16>
    %cst_6 = arith.constant dense<0.000000e+00> : vector<8x16xf32>
    %5 = tpu.matmul %1, %4, %cst_6 {dimension_numbers = #tpu.dot_dimension_numbers<[1], [0], [0], [1], [0, 0, 1, 1], [], []>} : vector<8x32xbf16>, vector<32x16xbf16>, vector<8x16xf32> -> vector<8x16xf32>
    %c0_7 = arith.constant 0 : index
    %c0_8 = arith.constant 0 : index
    %6 = vector.load %arg4[%c0_7, %c0_8] : memref<32x16xbf16, #tpu.memory_space<vmem>>, vector<32x16xbf16>
    %cst_9 = arith.constant dense<0.000000e+00> : vector<8x16xf32>
    %7 = tpu.matmul %1, %6, %cst_9 {dimension_numbers = #tpu.dot_dimension_numbers<[1], [0], [0], [1], [0, 0, 1, 1], [], []>} : vector<8x32xbf16>, vector<32x16xbf16>, vector<8x16xf32> -> vector<8x16xf32>
    %8 = arith.truncf %3 : vector<8x16xf32> to vector<8x16xbf16>
    %9 = arith.truncf %5 : vector<8x16xf32> to vector<8x16xbf16>
    %10 = arith.truncf %7 : vector<8x16xf32> to vector<8x16xbf16>
    %cst_10 = arith.constant dense<0.000000e+00> : vector<8x8xf32>
    %11 = tpu.matmul %8, %9, %cst_10 {dimension_numbers = #tpu.dot_dimension_numbers<[1], [1], [0], [0], [0, 0, 1, 0], [], []>} : vector<8x16xbf16>, vector<8x16xbf16>, vector<8x8xf32> -> vector<8x8xf32>
    %cst_11 = arith.constant dense<0xFF800000> : vector<8xf32>
    %12 = vector.multi_reduction <maximumf>, %11, %cst_11 [1] : vector<8x8xf32> to vector<8xf32>
    %13 = vector.shape_cast %12 : vector<8xf32> to vector<8x1xf32>
    %14 = vector.broadcast %13 : vector<8x1xf32> to vector<8x8xf32>
    %15 = arith.subf %11, %14 : vector<8x8xf32>
    %16 = math.exp %15 : vector<8x8xf32>
    %cst_12 = arith.constant dense<0.000000e+00> : vector<8xf32>
    %17 = vector.multi_reduction <add>, %16, %cst_12 [1] : vector<8x8xf32> to vector<8xf32>
    %18 = vector.shape_cast %17 : vector<8xf32> to vector<8x1xf32>
    %19 = tpu.reciprocal %18 {approx = true} : vector<8x1xf32> -> vector<8x1xf32>
    %20 = vector.broadcast %19 : vector<8x1xf32> to vector<8x8xf32>
    %21 = arith.mulf %16, %20 : vector<8x8xf32>
    %22 = arith.truncf %21 : vector<8x8xf32> to vector<8x8xbf16>
    %cst_13 = arith.constant dense<0.000000e+00> : vector<8x16xf32>
    %23 = tpu.matmul %22, %10, %cst_13 {dimension_numbers = #tpu.dot_dimension_numbers<[1], [0], [0], [1], [0, 0, 1, 1], [], []>} : vector<8x8xbf16>, vector<8x16xbf16>, vector<8x16xf32> -> vector<8x16xf32>
    %24 = arith.truncf %23 : vector<8x16xf32> to vector<8x16xbf16>
    %c0_14 = arith.constant 0 : index
    %c0_15 = arith.constant 0 : index
    %25 = vector.load %arg5[%c0_14, %c0_15] : memref<16x32xbf16, #tpu.memory_space<vmem>>, vector<16x32xbf16>
    %cst_16 = arith.constant dense<0.000000e+00> : vector<8x32xf32>
    %26 = tpu.matmul %24, %25, %cst_16 {dimension_numbers = #tpu.dot_dimension_numbers<[1], [0], [0], [1], [0, 0, 1, 1], [], []>} : vector<8x16xbf16>, vector<16x32xbf16>, vector<8x32xf32> -> vector<8x32xf32>
    %27 = arith.extf %1 : vector<8x32xbf16> to vector<8x32xf32>
    %28 = arith.addf %26, %27 : vector<8x32xf32>
    %c0_17 = arith.constant 0 : index
    %c0_18 = arith.constant 0 : index
    %29 = vector.load %arg6[%c0_17, %c0_18] : memref<1x32xbf16, #tpu.memory_space<vmem>>, vector<1x32xbf16>
    %c0_19 = arith.constant 0 : index
    %c0_20 = arith.constant 0 : index
    %30 = vector.load %arg7[%c0_19, %c0_20] : memref<1x32xbf16, #tpu.memory_space<vmem>>, vector<1x32xbf16>
    %cst_21 = arith.constant dense<0.000000e+00> : vector<8xf32>
    %31 = vector.multi_reduction <add>, %28, %cst_21 [1] : vector<8x32xf32> to vector<8xf32>
    %32 = vector.shape_cast %31 : vector<8xf32> to vector<8x1xf32>
    %cst_22 = arith.constant 3.200000e+01 : f32
    %33 = vector.broadcast %cst_22 : f32 to vector<8x1xf32>
    %34 = arith.divf %32, %33 : vector<8x1xf32>
    %35 = vector.broadcast %34 : vector<8x1xf32> to vector<8x32xf32>
    %36 = arith.subf %28, %35 : vector<8x32xf32>
    %37 = arith.mulf %36, %36 : vector<8x32xf32>
    %cst_23 = arith.constant dense<0.000000e+00> : vector<8xf32>
    %38 = vector.multi_reduction <add>, %37, %cst_23 [1] : vector<8x32xf32> to vector<8xf32>
    %39 = vector.shape_cast %38 : vector<8xf32> to vector<8x1xf32>
    %cst_24 = arith.constant 3.200000e+01 : f32
    %40 = vector.broadcast %cst_24 : f32 to vector<8x1xf32>
    %41 = arith.divf %39, %40 : vector<8x1xf32>
    %42 = vector.broadcast %34 : vector<8x1xf32> to vector<8x32xf32>
    %43 = arith.subf %28, %42 : vector<8x32xf32>
    %cst_25 = arith.constant 9.99999997E-7 : f32
    %44 = vector.broadcast %cst_25 : f32 to vector<8x1xf32>
    %45 = arith.addf %41, %44 : vector<8x1xf32>
    %46 = math.rsqrt %45 : vector<8x1xf32>
    %47 = vector.broadcast %46 : vector<8x1xf32> to vector<8x32xf32>
    %48 = arith.mulf %43, %47 : vector<8x32xf32>
    %49 = arith.extf %29 : vector<1x32xbf16> to vector<1x32xf32>
    %50 = vector.broadcast %49 : vector<1x32xf32> to vector<8x32xf32>
    %51 = arith.mulf %48, %50 : vector<8x32xf32>
    %52 = arith.extf %30 : vector<1x32xbf16> to vector<1x32xf32>
    %53 = vector.broadcast %52 : vector<1x32xf32> to vector<8x32xf32>
    %54 = arith.addf %51, %53 : vector<8x32xf32>
    %55 = arith.truncf %54 : vector<8x32xf32> to vector<8x32xbf16>
    %c0_26 = arith.constant 0 : index
    %c0_27 = arith.constant 0 : index
    %c0_28 = arith.constant 0 : index
    %56 = vector.load %arg8[%c0_26, %c0_27, %c0_28] : memref<1x8x32xbf16, #tpu.memory_space<vmem>>, vector<1x8x32xbf16>
    %57 = vector.shape_cast %56 : vector<1x8x32xbf16> to vector<8x32xbf16>
    %58 = vector.shape_cast %55 : vector<8x32xbf16> to vector<1x8x32xbf16>
    tpu.vector_store %arg8[%c0_26, %c0_27, %c0_28], %58 {strides = array<i32>} : memref<1x8x32xbf16, #tpu.memory_space<vmem>>, vector<1x8x32xbf16>,
    return
  }
  func.func @transform_0(%arg0: i32) -> (i32, i32, i32) {
    %c0_i32 = arith.constant 0 : i32
    %c0_i32_0 = arith.constant 0 : i32
    %c0_i32_1 = arith.constant 0 : i32
    return %arg0, %c0_i32, %c0_i32_0 : i32, i32, i32
  }
  func.func @transform_1(%arg0: i32) -> (i32, i32) {
    %c0_i32 = arith.constant 0 : i32
    %c0_i32_0 = arith.constant 0 : i32
    %c0_i32_1 = arith.constant 0 : i32
    return %c0_i32, %c0_i32_0 : i32, i32
  }
  func.func @transform_2(%arg0: i32) -> (i32, i32) {
    %c0_i32 = arith.constant 0 : i32
    %c0_i32_0 = arith.constant 0 : i32
    %c0_i32_1 = arith.constant 0 : i32
    return %c0_i32, %c0_i32_0 : i32, i32
  }
  func.func @transform_3(%arg0: i32) -> (i32, i32) {
    %c0_i32 = arith.constant 0 : i32
    %c0_i32_0 = arith.constant 0 : i32
    %c0_i32_1 = arith.constant 0 : i32
    return %c0_i32, %c0_i32_0 : i32, i32
  }
  func.func @transform_4(%arg0: i32) -> (i32, i32) {
    %c0_i32 = arith.constant 0 : i32
    %c0_i32_0 = arith.constant 0 : i32
    %c0_i32_1 = arith.constant 0 : i32
    return %c0_i32, %c0_i32_0 : i32, i32
  }
  func.func @transform_5(%arg0: i32) -> (i32, i32) {
    %c0_i32 = arith.constant 0 : i32
    %c0_i32_0 = arith.constant 0 : i32
    %c0_i32_1 = arith.constant 0 : i32
    return %c0_i32, %c0_i32_0 : i32, i32
  }
  func.func @transform_6(%arg0: i32) -> (i32, i32) {
    %c0_i32 = arith.constant 0 : i32
    %c0_i32_0 = arith.constant 0 : i32
    %c0_i32_1 = arith.constant 0 : i32
    return %c0_i32, %c0_i32_0 : i32, i32
  }
  func.func @transform_7(%arg0: i32) -> (i32, i32, i32) {
    %c0_i32 = arith.constant 0 : i32
    %c0_i32_0 = arith.constant 0 : i32
    %c0_i32_1 = arith.constant 0 : i32
    return %arg0, %c0_i32, %c0_i32_0 : i32, i32, i32
  }
}

module attributes {stable_mosaic.version = 11 : i64} {
  func.func @_ffn_block_kernel(%arg0: i32, %arg1: memref<16x32xbf16, #tpu.memory_space<vmem>>, %arg2: memref<32x64xbf16, #tpu.memory_space<vmem>>, %arg3: memref<1x64xbf16, #tpu.memory_space<vmem>>, %arg4: memref<64x32xbf16, #tpu.memory_space<vmem>>, %arg5: memref<1x32xbf16, #tpu.memory_space<vmem>>, %arg6: memref<1x32xbf16, #tpu.memory_space<vmem>>, %arg7: memref<1x32xbf16, #tpu.memory_space<vmem>>, %arg8: memref<16x32xbf16, #tpu.memory_space<vmem>>) attributes {dimension_semantics = [#tpu.dimension_semantics<parallel>], iteration_bounds = array<i64: 1>, scalar_prefetch = 0 : i64, scratch_operands = 0 : i64, tpu.core_type = #tpu.core_type<tc>, window_params = [{transform_indices = @transform_0, window_bounds = array<i64: 16, 32>}, {pipeline_mode = #tpu.pipeline_mode<synchronous>, transform_indices = @transform_1, window_bounds = array<i64: 32, 64>}, {pipeline_mode = #tpu.pipeline_mode<synchronous>, transform_indices = @transform_2, window_bounds = array<i64: 1, 64>}, {pipeline_mode = #tpu.pipeline_mode<synchronous>, transform_indices = @transform_3, window_bounds = array<i64: 64, 32>}, {pipeline_mode = #tpu.pipeline_mode<synchronous>, transform_indices = @transform_4, window_bounds = array<i64: 1, 32>}, {pipeline_mode = #tpu.pipeline_mode<synchronous>, transform_indices = @transform_5, window_bounds = array<i64: 1, 32>}, {pipeline_mode = #tpu.pipeline_mode<synchronous>, transform_indices = @transform_6, window_bounds = array<i64: 1, 32>}, {transform_indices = @transform_7, window_bounds = array<i64: 16, 32>}]} {
    %c0 = arith.constant 0 : index
    %c0_0 = arith.constant 0 : index
    %0 = vector.load %arg1[%c0, %c0_0] : memref<16x32xbf16, #tpu.memory_space<vmem>>, vector<16x32xbf16>
    %c0_1 = arith.constant 0 : index
    %c0_2 = arith.constant 0 : index
    %1 = vector.load %arg2[%c0_1, %c0_2] : memref<32x64xbf16, #tpu.memory_space<vmem>>, vector<32x64xbf16>
    %cst = arith.constant dense<0.000000e+00> : vector<16x64xf32>
    %2 = tpu.matmul %0, %1, %cst {dimension_numbers = #tpu.dot_dimension_numbers<[1], [0], [0], [1], [0, 0, 1, 1], [], []>} : vector<16x32xbf16>, vector<32x64xbf16>, vector<16x64xf32> -> vector<16x64xf32>
    %c0_3 = arith.constant 0 : index
    %c0_4 = arith.constant 0 : index
    %3 = vector.load %arg3[%c0_3, %c0_4] : memref<1x64xbf16, #tpu.memory_space<vmem>>, vector<1x64xbf16>
    %4 = arith.extf %3 : vector<1x64xbf16> to vector<1x64xf32>
    %5 = vector.broadcast %4 : vector<1x64xf32> to vector<16x64xf32>
    %6 = arith.addf %2, %5 : vector<16x64xf32>
    %cst_5 = arith.constant 0.000000e+00 : f32
    %7 = vector.broadcast %cst_5 : f32 to vector<16x64xf32>
    %8 = arith.maximumf %6, %7 : vector<16x64xf32>
    %9 = arith.truncf %8 : vector<16x64xf32> to vector<16x64xbf16>
    %c0_6 = arith.constant 0 : index
    %c0_7 = arith.constant 0 : index
    %10 = vector.load %arg4[%c0_6, %c0_7] : memref<64x32xbf16, #tpu.memory_space<vmem>>, vector<64x32xbf16>
    %cst_8 = arith.constant dense<0.000000e+00> : vector<16x32xf32>
    %11 = tpu.matmul %9, %10, %cst_8 {dimension_numbers = #tpu.dot_dimension_numbers<[1], [0], [0], [1], [0, 0, 1, 1], [], []>} : vector<16x64xbf16>, vector<64x32xbf16>, vector<16x32xf32> -> vector<16x32xf32>
    %c0_9 = arith.constant 0 : index
    %c0_10 = arith.constant 0 : index
    %12 = vector.load %arg5[%c0_9, %c0_10] : memref<1x32xbf16, #tpu.memory_space<vmem>>, vector<1x32xbf16>
    %13 = arith.extf %12 : vector<1x32xbf16> to vector<1x32xf32>
    %14 = vector.broadcast %13 : vector<1x32xf32> to vector<16x32xf32>
    %15 = arith.addf %11, %14 : vector<16x32xf32>
    %16 = arith.extf %0 : vector<16x32xbf16> to vector<16x32xf32>
    %17 = arith.addf %15, %16 : vector<16x32xf32>
    %c0_11 = arith.constant 0 : index
    %c0_12 = arith.constant 0 : index
    %18 = vector.load %arg6[%c0_11, %c0_12] : memref<1x32xbf16, #tpu.memory_space<vmem>>, vector<1x32xbf16>
    %c0_13 = arith.constant 0 : index
    %c0_14 = arith.constant 0 : index
    %19 = vector.load %arg7[%c0_13, %c0_14] : memref<1x32xbf16, #tpu.memory_space<vmem>>, vector<1x32xbf16>
    %cst_15 = arith.constant dense<0.000000e+00> : vector<16xf32>
    %20 = vector.multi_reduction <add>, %17, %cst_15 [1] : vector<16x32xf32> to vector<16xf32>
    %21 = vector.shape_cast %20 : vector<16xf32> to vector<16x1xf32>
    %cst_16 = arith.constant 3.200000e+01 : f32
    %22 = vector.broadcast %cst_16 : f32 to vector<16x1xf32>
    %23 = arith.divf %21, %22 : vector<16x1xf32>
    %24 = vector.broadcast %23 : vector<16x1xf32> to vector<16x32xf32>
    %25 = arith.subf %17, %24 : vector<16x32xf32>
    %26 = arith.mulf %25, %25 : vector<16x32xf32>
    %cst_17 = arith.constant dense<0.000000e+00> : vector<16xf32>
    %27 = vector.multi_reduction <add>, %26, %cst_17 [1] : vector<16x32xf32> to vector<16xf32>
    %28 = vector.shape_cast %27 : vector<16xf32> to vector<16x1xf32>
    %cst_18 = arith.constant 3.200000e+01 : f32
    %29 = vector.broadcast %cst_18 : f32 to vector<16x1xf32>
    %30 = arith.divf %28, %29 : vector<16x1xf32>
    %31 = vector.broadcast %23 : vector<16x1xf32> to vector<16x32xf32>
    %32 = arith.subf %17, %31 : vector<16x32xf32>
    %cst_19 = arith.constant 9.99999997E-7 : f32
    %33 = vector.broadcast %cst_19 : f32 to vector<16x1xf32>
    %34 = arith.addf %30, %33 : vector<16x1xf32>
    %35 = math.rsqrt %34 : vector<16x1xf32>
    %36 = vector.broadcast %35 : vector<16x1xf32> to vector<16x32xf32>
    %37 = arith.mulf %32, %36 : vector<16x32xf32>
    %38 = arith.extf %18 : vector<1x32xbf16> to vector<1x32xf32>
    %39 = vector.broadcast %38 : vector<1x32xf32> to vector<16x32xf32>
    %40 = arith.mulf %37, %39 : vector<16x32xf32>
    %41 = arith.extf %19 : vector<1x32xbf16> to vector<1x32xf32>
    %42 = vector.broadcast %41 : vector<1x32xf32> to vector<16x32xf32>
    %43 = arith.addf %40, %42 : vector<16x32xf32>
    %44 = arith.truncf %43 : vector<16x32xf32> to vector<16x32xbf16>
    %c0_20 = arith.constant 0 : index
    %c0_21 = arith.constant 0 : index
    %45 = vector.load %arg8[%c0_20, %c0_21] : memref<16x32xbf16, #tpu.memory_space<vmem>>, vector<16x32xbf16>
    tpu.vector_store %arg8[%c0_20, %c0_21], %44 {strides = array<i32>} : memref<16x32xbf16, #tpu.memory_space<vmem>>, vector<16x32xbf16>,
    return
  }
  func.func @transform_0(%arg0: i32) -> (i32, i32) {
    %c0_i32 = arith.constant 0 : i32
    %c0_i32_0 = arith.constant 0 : i32
    return %arg0, %c0_i32 : i32, i32
  }
  func.func @transform_1(%arg0: i32) -> (i32, i32) {
    %c0_i32 = arith.constant 0 : i32
    %c0_i32_0 = arith.constant 0 : i32
    %c0_i32_1 = arith.constant 0 : i32
    return %c0_i32, %c0_i32_0 : i32, i32
  }
  func.func @transform_2(%arg0: i32) -> (i32, i32) {
    %c0_i32 = arith.constant 0 : i32
    %c0_i32_0 = arith.constant 0 : i32
    %c0_i32_1 = arith.constant 0 : i32
    return %c0_i32, %c0_i32_0 : i32, i32
  }
  func.func @transform_3(%arg0: i32) -> (i32, i32) {
    %c0_i32 = arith.constant 0 : i32
    %c0_i32_0 = arith.constant 0 : i32
    %c0_i32_1 = arith.constant 0 : i32
    return %c0_i32, %c0_i32_0 : i32, i32
  }
  func.func @transform_4(%arg0: i32) -> (i32, i32) {
    %c0_i32 = arith.constant 0 : i32
    %c0_i32_0 = arith.constant 0 : i32
    %c0_i32_1 = arith.constant 0 : i32
    return %c0_i32, %c0_i32_0 : i32, i32
  }
  func.func @transform_5(%arg0: i32) -> (i32, i32) {
    %c0_i32 = arith.constant 0 : i32
    %c0_i32_0 = arith.constant 0 : i32
    %c0_i32_1 = arith.constant 0 : i32
    return %c0_i32, %c0_i32_0 : i32, i32
  }
  func.func @transform_6(%arg0: i32) -> (i32, i32) {
    %c0_i32 = arith.constant 0 : i32
    %c0_i32_0 = arith.constant 0 : i32
    %c0_i32_1 = arith.constant 0 : i32
    return %c0_i32, %c0_i32_0 : i32, i32
  }
  func.func @transform_7(%arg0: i32) -> (i32, i32) {
    %c0_i32 = arith.constant 0 : i32
    %c0_i32_0 = arith.constant 0 : i32
    return %arg0, %c0_i32 : i32, i32
  }
}

module attributes {stable_mosaic.version = 11 : i64} {
  func.func @_score_kernel(%arg0: i32, %arg1: memref<16x32xbf16, #tpu.memory_space<vmem>>, %arg2: memref<32x32xbf16, #tpu.memory_space<vmem>>, %arg3: memref<1x32xbf16, #tpu.memory_space<vmem>>, %arg4: memref<1x32xbf16, #tpu.memory_space<vmem>>, %arg5: memref<1x1xbf16, #tpu.memory_space<vmem>>, %arg6: memref<1x16xf32, #tpu.memory_space<vmem>>) attributes {dimension_semantics = [#tpu.dimension_semantics<parallel>], iteration_bounds = array<i64: 1>, scalar_prefetch = 0 : i64, scratch_operands = 0 : i64, tpu.core_type = #tpu.core_type<tc>, window_params = [{transform_indices = @transform_0, window_bounds = array<i64: 16, 32>}, {pipeline_mode = #tpu.pipeline_mode<synchronous>, transform_indices = @transform_1, window_bounds = array<i64: 32, 32>}, {pipeline_mode = #tpu.pipeline_mode<synchronous>, transform_indices = @transform_2, window_bounds = array<i64: 1, 32>}, {pipeline_mode = #tpu.pipeline_mode<synchronous>, transform_indices = @transform_3, window_bounds = array<i64: 1, 32>}, {pipeline_mode = #tpu.pipeline_mode<synchronous>, transform_indices = @transform_4, window_bounds = array<i64: 1, 1>}, {transform_indices = @transform_5, window_bounds = array<i64: 1, 16>}]} {
    %c0 = arith.constant 0 : index
    %c0_0 = arith.constant 0 : index
    %0 = vector.load %arg1[%c0, %c0_0] : memref<16x32xbf16, #tpu.memory_space<vmem>>, vector<16x32xbf16>
    %c0_1 = arith.constant 0 : index
    %c0_2 = arith.constant 0 : index
    %1 = vector.load %arg2[%c0_1, %c0_2] : memref<32x32xbf16, #tpu.memory_space<vmem>>, vector<32x32xbf16>
    %cst = arith.constant dense<0.000000e+00> : vector<16x32xf32>
    %2 = tpu.matmul %0, %1, %cst {dimension_numbers = #tpu.dot_dimension_numbers<[1], [0], [0], [1], [0, 0, 1, 1], [], []>} : vector<16x32xbf16>, vector<32x32xbf16>, vector<16x32xf32> -> vector<16x32xf32>
    %c0_3 = arith.constant 0 : index
    %c0_4 = arith.constant 0 : index
    %3 = vector.load %arg3[%c0_3, %c0_4] : memref<1x32xbf16, #tpu.memory_space<vmem>>, vector<1x32xbf16>
    %4 = arith.extf %3 : vector<1x32xbf16> to vector<1x32xf32>
    %5 = vector.broadcast %4 : vector<1x32xf32> to vector<16x32xf32>
    %6 = arith.addf %2, %5 : vector<16x32xf32>
    %cst_5 = arith.constant 0.000000e+00 : f32
    %7 = vector.broadcast %cst_5 : f32 to vector<16x32xf32>
    %8 = arith.maximumf %6, %7 : vector<16x32xf32>
    %c0_6 = arith.constant 0 : index
    %c0_7 = arith.constant 0 : index
    %9 = vector.load %arg4[%c0_6, %c0_7] : memref<1x32xbf16, #tpu.memory_space<vmem>>, vector<1x32xbf16>
    %10 = arith.extf %9 : vector<1x32xbf16> to vector<1x32xf32>
    %cst_8 = arith.constant dense<0.000000e+00> : vector<1x16xf32>
    %11 = tpu.matmul %10, %8, %cst_8 {dimension_numbers = #tpu.dot_dimension_numbers<[1], [1], [0], [0], [0, 0, 1, 0], [], []>} : vector<1x32xf32>, vector<16x32xf32>, vector<1x16xf32> -> vector<1x16xf32>
    %c0_9 = arith.constant 0 : index
    %c0_10 = arith.constant 0 : index
    %12 = vector.load %arg5[%c0_9, %c0_10] : memref<1x1xbf16, #tpu.memory_space<vmem>>, vector<1x1xbf16>
    %13 = arith.extf %12 : vector<1x1xbf16> to vector<1x1xf32>
    %14 = vector.broadcast %13 : vector<1x1xf32> to vector<1x16xf32>
    %15 = arith.addf %11, %14 : vector<1x16xf32>
    %16 = arith.negf %15 : vector<1x16xf32>
    %17 = math.exp %16 : vector<1x16xf32>
    %cst_11 = arith.constant 1.000000e+00 : f32
    %18 = vector.broadcast %cst_11 : f32 to vector<1x16xf32>
    %19 = arith.addf %18, %17 : vector<1x16xf32>
    %20 = arith.divf %18, %19 : vector<1x16xf32>
    %c0_12 = arith.constant 0 : index
    %c0_13 = arith.constant 0 : index
    %21 = vector.load %arg6[%c0_12, %c0_13] : memref<1x16xf32, #tpu.memory_space<vmem>>, vector<1x16xf32>
    tpu.vector_store %arg6[%c0_12, %c0_13], %20 {strides = array<i32>} : memref<1x16xf32, #tpu.memory_space<vmem>>, vector<1x16xf32>,
    return
  }
  func.func @transform_0(%arg0: i32) -> (i32, i32) {
    %c0_i32 = arith.constant 0 : i32
    %c0_i32_0 = arith.constant 0 : i32
    return %arg0, %c0_i32 : i32, i32
  }
  func.func @transform_1(%arg0: i32) -> (i32, i32) {
    %c0_i32 = arith.constant 0 : i32
    %c0_i32_0 = arith.constant 0 : i32
    %c0_i32_1 = arith.constant 0 : i32
    return %c0_i32, %c0_i32_0 : i32, i32
  }
  func.func @transform_2(%arg0: i32) -> (i32, i32) {
    %c0_i32 = arith.constant 0 : i32
    %c0_i32_0 = arith.constant 0 : i32
    %c0_i32_1 = arith.constant 0 : i32
    return %c0_i32, %c0_i32_0 : i32, i32
  }
  func.func @transform_3(%arg0: i32) -> (i32, i32) {
    %c0_i32 = arith.constant 0 : i32
    %c0_i32_0 = arith.constant 0 : i32
    %c0_i32_1 = arith.constant 0 : i32
    return %c0_i32, %c0_i32_0 : i32, i32
  }
  func.func @transform_4(%arg0: i32) -> (i32, i32) {
    %c0_i32 = arith.constant 0 : i32
    %c0_i32_0 = arith.constant 0 : i32
    %c0_i32_1 = arith.constant 0 : i32
    return %c0_i32, %c0_i32_0 : i32, i32
  }
  func.func @transform_5(%arg0: i32) -> (i32, i32) {
    %c0_i32 = arith.constant 0 : i32
    %c0_i32_0 = arith.constant 0 : i32
    return %c0_i32, %arg0 : i32, i32
  }
}

</mosaic_0001>

<bundles_post_ra>
// kernel: transformer_encoder.8
= control target key start
LH: loop header
LB: loop body
LE: loop exit
PB: predicated region body
PF: predicated region fallthrough
CT: control target
= control target key end

     0   :  { %v208_v0 = vmov 0.0   ;;  %vm209_vm0 = vmmov 0   ;;  %vm66_vm1 = vcmask 523264   ;;  %v33_v6 = vlaneseq  ;;  %s274_s1 = inlined_call_operand.vmem [shape: bf16[64,32], index: 1, kind: input, shape index: {}]   ;;  %s275_s0 = inlined_call_operand.vmem [shape: bf16[16,64], index: 0, kind: input, shape index: {}]   ;;  %s276_s2 = inlined_call_operand.vmem [shape: bf16[1,32], index: 2, kind: input, shape index: {}]   ;;  %s277_s3 = inlined_call_operand.vmem [shape: bf16[1,32], index: 3, kind: input, shape index: {}]   ;;  %s278_s4 = inlined_call_operand.vmem [shape: bf16[1,32], index: 4, kind: input, shape index: {}]   ;;  %s279_s5 = inlined_call_operand.vmem [shape: bf16[16,32], index: 5, kind: output, shape index: {}]  }
   0x1   :  { %185 = vmatprep.subr.bf16.mxu0 %v208_v0  ;;  %v199_v1 = vld [vmem:[%s274_s1] sm:$0xff]   ;;  %193 = vmatprep.mubr.msk.bf16.mxu0 %vm209_vm0, %v208_v0  ;;  %v200_v2 = vld [vmem:[%s274_s1 + $0x8] sm:$0xff]   ;;  %v201_v3 = vld [vmem:[%s274_s1 + $0x10] sm:$0xff]   ;;  %vm113_vm2 = vcmask 261120   ;;  %vm163_vm3 = vcmask 257024  }
   0x2   :  { %186 = vmatpush3.bf16.msra.mxu0 %v199_v1  ;;  %v202_v4 = vld [vmem:[%s274_s1 + $0x18] sm:$0xff]   ;;  %v203_v5 = vld [vmem:[%s275_s0] sm:$0xff]   ;;  %v34_v7 = vshrl.u32 %v33_v6, 7 }
   0x3   :  { %187 = vmatprep.subr.bf16.mxu0 %v208_v0  ;;  %v31_v8 = vld [vmem:[%s276_s2] sm:$0x1] }
   0x4   :  { %v32_v9 = vunpack.c.l.bf16 %v31_v8  ;;  %v35_v10 = vsub.s32 0, %v34_v7  ;;  %v111_v35 = vld [vmem:[%s277_s3] sm:$0x1] }
   0x5   :  { %v112_v37 = vld [vmem:[%s278_s4] sm:$0x1]  ;;  %v141_v38 = vunpack.c.l.bf16 %v111_v35 }
   0x6   :  { %188 = vmatpush3.bf16.msra.mxu0 %v200_v2  ;;  %v36_v11 = vrot.slane %v32_v9, %v35_v10  ;;  %v148_v39 = vunpack.c.l.bf16 %v112_v37 }
   0x7   :  { %189 = vmatprep.subr.bf16.mxu0 %v208_v0  ;;  %v145_v40 = vrot.slane %v141_v38, %v35_v10 }
   0x8   :  { %v152_v42 = vrot.slane %v148_v39, %v35_v10 }
   0xa   :  { %190 = vmatpush3.bf16.msra.mxu0 %v201_v3 }
   0xb   :  { %191 = vmatprep.subr.bf16.mxu0 %v208_v0 }
   0xe   :  { %192 = vmatpush3.bf16.msra.mxu0 %v202_v4 }
  0x11   :  { %194 = vmatmul.mubr.msk.bf16.vlgmr.msra.gmra.mrb[0].mxu0 %vm66_vm1, %v203_v5 }
  0xe4   :  { %v104_v12 = vpop.f32.mrb[0].mxu0 }
  0xe5   :  { %v105_v13 = vadd.f32 %v104_v12, %v36_v11  ;;  %v195_v14 = vpop.f32.mrb[1].mxu0 }
  0xe6   :  { %v107_v15 = vpop.f32.mrb[2].mxu0 }
  0xe7   :  { %v108_v16 = vadd.f32 %v107_v15, %v36_v11  ;;  %v196_v17 = vpop.f32.mrb[3].mxu0  ;;  %v114_v18 = vsel %vm113_vm2, %v105_v13, 0.0 }
  0xe8   :  { %115 = vadd.xlane.f32.xlu0 %v114_v18 }
  0xe9   :  { %v117_v19 = vsel %vm113_vm2, %v108_v16, 0.0 }
  0xec   :  { %118 = vadd.xlane.f32.xlu0 %v117_v19 }
 0x175   :  { %v116_v20 = vpop.xlane.xlu0 %115 }
 0x176   :  { %v121_v21 = vmul.f32 0.03125, %v116_v20 }
 0x178   :  { %v123_v22 = vsub.f32 %v105_v13, %v121_v21 }
 0x179   :  { %v119_v23 = vpop.xlane.xlu0 %118 }
 0x17a   :  { %v122_v24 = vmul.f32 0.03125, %v119_v23  ;;  %v125_v25 = vmul.f32 %v123_v22, %v123_v22 }
 0x17c   :  { %v124_v26 = vsub.f32 %v108_v16, %v122_v24  ;;  %v127_v27 = vsel %vm113_vm2, %v125_v25, 0.0 }
 0x17d   :  { %128 = vadd.xlane.f32.xlu1 %v127_v27 }
 0x17e   :  { %v126_v28 = vmul.f32 %v124_v26, %v124_v26 }
 0x180   :  { %v130_v29 = vsel %vm113_vm2, %v126_v28, 0.0 }
 0x181   :  { %131 = vadd.xlane.f32.xlu1 %v130_v29 }
 0x20a   :  { %v129_v30 = vpop.xlane.xlu1 %128 }
 0x20b   :  { %v133_v31 = vmul.f32 0.03125, %v129_v30 }
 0x20d   :  { %v135_v32 = vadd.f32 1e-06, %v133_v31 }
 0x20e   :  { %v132_v33 = vpop.xlane.xlu1 %131 }
 0x20f   :  { %204 = vrsqrt.f32 %v135_v32  ;;  %v134_v34 = vmul.f32 0.03125, %v132_v33 }
 0x211   :  { %v136_v36 = vadd.f32 1e-06, %v134_v34 }
 0x213   :  { %206 = vrsqrt.f32 %v136_v36 }
 0x219   :  { %v205_v41 = vpop.eup %204 }
 0x21a   :  { %v139_v43 = vmul.f32 %v205_v41, %v123_v22 }
 0x21c   :  { %v146_v44 = vmul.f32 %v145_v40, %v139_v43 }
 0x21d   :  { %v207_v45 = vpop.eup %206 }
 0x21e   :  { %v153_v46 = vadd.f32 %v152_v42, %v146_v44  ;;  %v140_v47 = vmul.f32 %v207_v45, %v124_v26 }
 0x220   :  { %v178_v48 = vpack.c.bf16 %v153_v46, %v153_v46  ;;  %v147_v49 = vmul.f32 %v145_v40, %v140_v47 }
 0x222   :  { %164 = vst.msk [vmem:[%s279_s5] sm:$0xf] %vm163_vm3, %v178_v48  ;;  %v154_v50 = vadd.f32 %v152_v42, %v147_v49 }
 0x224   :  { %v179_v51 = vpack.c.bf16 %v154_v50, %v154_v50 }
 0x226   :  { %165 = vst.msk [vmem:[%s279_s5 + $0x4] sm:$0xf] %vm163_vm3, %v179_v51 }

// kernel: transformer_encoder.9
= control target key start
LH: loop header
LB: loop body
LE: loop exit
PB: predicated region body
PF: predicated region fallthrough
CT: control target
= control target key end

     0   :  { %s847_s24 = smov 0   ;;  %s921_s0 = inlined_call_operand.vmem [shape: bf16[2,8,32], index: 0, kind: input, shape index: {}]   ;;  %s922_s1 = inlined_call_operand.vmem [shape: bf16[32,16], index: 1, kind: input, shape index: {}]   ;;  %s923_s2 = inlined_call_operand.vmem [shape: bf16[32,16], index: 2, kind: input, shape index: {}]   ;;  %s924_s3 = inlined_call_operand.vmem [shape: bf16[32,16], index: 3, kind: input, shape index: {}]   ;;  %s925_s4 = inlined_call_operand.vmem [shape: bf16[16,32], index: 4, kind: input, shape index: {}]   ;;  %s926_s5 = inlined_call_operand.vmem [shape: bf16[1,32], index: 5, kind: input, shape index: {}]   ;;  %s927_s6 = inlined_call_operand.vmem [shape: bf16[1,32], index: 6, kind: input, shape index: {}]   ;;  %s928_s7 = inlined_call_operand.vmem [shape: bf16[2,8,32], index: 7, kind: output, shape index: {}]  }
   0x1 LB: > { %s695_s25 = sadd.s32 4294967295, %s803_s24   ;;  %p699_p0 = scmp.ge.s32.totalorder %s803_s24, 1  ;;  %s803_s24 = sphi %s847_s24, %s17_s24  }
   0x2   : > { %p236_p1 = scmp.lt.s32.totalorder %s803_s24, 3 }
   0x4   : > { %p237_p2 = pnand %p699_p0, %p236_p1 }
   0x5   : > { %v784_v0 = vld [vmem:[%s923_s2] sm:$0xff] (!%p237_p2)   ;;  %v805_v1 = vmov (!%p237_p2), 0.0   ;;  %v785_v2 = vld [vmem:[%s923_s2 + $0x8] sm:$0xff] (!%p237_p2)   ;;  %vm806_vm0 = vmmov (!%p237_p2), 0   ;;  %p266_p3 = scmp.lt.s32.totalorder (!%p237_p2), %s695_s25, 1  ;;  %vm292_vm1 = vcmask (!%p237_p2), 261120   ;;  %v628_v59 = vlaneseq (!%p237_p2) }
   0x6   : > { %240 = sbr.rel (%p237_p2) target bundleno = 1511 (0x5e7), region = 48  ;;  %740 = vmatprep.subr.bf16.mxu1 (!%p237_p2), %v805_v1  ;;  %732 = vmatprep.subr.bf16.mxu0 (!%p237_p2), %v805_v1  ;;  %v786_v3 = vld [vmem:[%s922_s1] sm:$0xff] (!%p237_p2)   ;;  %v787_v4 = vld [vmem:[%s922_s1 + $0x8] sm:$0xff] (!%p237_p2)   ;;  %vm451_vm2 = vcmask (!%p237_p2), 130048   ;;  %vm498_vm3 = vcmask (!%p237_p2), 64512   ;;  %vm514_vm4 = vcmask (!%p237_p2), 1043456  }
   0x7   : > { %741 = vmatpush3.bf16.msra.mxu1 (!%p237_p2), %v784_v0  ;;  %744 = vmatprep.mubr.msk.bf16.mxu1 (!%p237_p2), %vm806_vm0, %v805_v1  ;;  %v788_v17 = vld [vmem:[%s924_s3] sm:$0xff] (!%p237_p2)   ;;  %v789_v18 = vld [vmem:[%s924_s3 + $0x8] sm:$0xff] (!%p237_p2)   ;;  %v629_v61 = vshrl.u32 (!%p237_p2), %v628_v59, 7  ;;  %vm640_vm5 = vcmask (!%p237_p2), 257024  }
   0x8   : > { %742 = vmatprep.subr.bf16.mxu1 (!%p237_p2), %v805_v1  ;;  %736 = vmatprep.mubr.msk.bf16.mxu0 (!%p237_p2), %vm806_vm0, %v805_v1  ;;  %v790_v35 = vld [vmem:[%s925_s4] sm:$0xff] (!%p237_p2)  }
   0x9   : > { %733 = vmatpush3.bf16.msra.mxu0 (!%p237_p2), %v786_v3  ;;  %v611_v62 = vld [vmem:[%s926_s5] sm:$0x1] (!%p237_p2) }
   0xa   : > { %734 = vmatprep.subr.bf16.mxu0 (!%p237_p2), %v805_v1  ;;  %v612_v63 = vld [vmem:[%s927_s6] sm:$0x1] (!%p237_p2)  ;;  %v627_v0 = vunpack.c.l.bf16 (!%p237_p2), %v611_v62 }
   0xb   : > { %743 = vmatpush3.bf16.msra.mxu1 (!%p237_p2), %v785_v2  ;;  %v633_v2 = vunpack.c.l.bf16 (!%p237_p2), %v612_v63 }
   0xc   : > { %756 = vmatprep.subr.bf16.mxu1 (!%p237_p2), %v805_v1 }
   0xd   : > { %s930_s25 = smov (!%p266_p3, %s695_s25), 1  ;;  %735 = vmatpush3.bf16.msra.mxu0 %v787_v4 }
   0xe   : > { %s700_s11 = sshll.u32 %s930_s25, 2  ;;  %748 = vmatprep.subr.bf16.mxu0 %v805_v1 }
   0xf   : > { %s269_s14 = scalar_lea.vmem %s921_s0, %s700_s11  ;;  %s273_s29 = scalar_lea.vmem %s928_s7, %s700_s11 }
  0x10   : > { %v877_v5 = vld [vmem:[%s269_s14] sm:$0xf] }
  0x11   : > { %745 = vmatmul.mubr.msk.bf16.vlgmr.msra.gmra.mrb[0].mxu1 %vm292_vm1, %v877_v5  ;;  %737 = vmatmul.mubr.msk.bf16.vlgmr.msra.gmra.mrb[0].mxu0 %vm292_vm1, %v877_v5  ;;  %v561_v45 = vunpack.c.l.bf16 %v877_v5 }
  0x12   : > { %758 = vmatprep.mubr.msk.bf16.mxu1 %vm806_vm0, %v805_v1  ;;  %752 = vmatprep.mubr.msk.bf16.mxu0 %vm806_vm0, %v805_v1 }
  0x13   : > { %749 = vmatpush3.bf16.msra.mxu0 %v788_v17 }
  0x14   : > { %750 = vmatprep.subr.bf16.mxu0 %v805_v1 }
  0x17   : > { %751 = vmatpush3.bf16.msra.mxu0 %v789_v18 }
  0x18   : > { %762 = vmatprep.subr.bf16.mxu0 %v805_v1 }
  0x1a   : > { %753 = vmatmul.mubr.msk.bf16.vlgmr.msra.gmra.mrb[4].mxu0 %vm292_vm1, %v877_v5 }
  0x1b   : > { %764 = vmatprep.mubr.msk.bf16.mxu0 %vm806_vm0, %v805_v1 }
  0xe4   : > { %v386_v6 = vpop.f32.mrb[0].mxu1  ;;  %v330_v10 = vpop.f32.mrb[0].mxu0 }
  0xe5   : > { %v449_v7 = vpack.c.bf16 %v386_v6, %v386_v6  ;;  %v746_v8 = vpop.f32.mrb[1].mxu1  ;;  %v738_v13 = vpop.f32.mrb[1].mxu0  ;;  %v448_v16 = vpack.c.bf16 %v330_v10, %v330_v10 }
  0xe6   : > { %v389_v9 = vpop.f32.mrb[2].mxu1  ;;  %v333_v14 = vpop.f32.mrb[2].mxu0 }
  0xe7   : > { %v456_v11 = vsel %vm451_vm2, %v449_v7, 0  ;;  %v747_v12 = vpop.f32.mrb[3].mxu1  ;;  %v739_v15 = vpop.f32.mrb[3].mxu0 }
  0xe8   : > { %757 = vmatpush3.bf16.xpose.msra.mxu1 %v456_v11 }
  0xe9   : > { %768 = vmatprep.subr.bf16.mxu1 %v805_v1 }
  0xed   : > { %v442_v29 = vpop.f32.mrb[4].mxu0 }
  0xee   : > { %v754_v30 = vpop.f32.mrb[5].mxu0  ;;  %v450_v33 = vpack.c.bf16 %v442_v29, %v442_v29 }
  0xef   : > { %759 = vmatmul.mubr.msk.bf16.vlgmr.msra.gmra.mrb[4].mxu1 %vm451_vm2, %v448_v16  ;;  %v445_v31 = vpop.f32.mrb[6].mxu0 }
  0xf0   : > { %770 = vmatprep.mubr.msk.bf16.mxu1 %vm806_vm0, %v805_v1  ;;  %v755_v32 = vpop.f32.mrb[7].mxu0  ;;  %v516_v34 = vsel %vm514_vm4, %v450_v33, 0  ;;  %769 = vmatpush3.bf16.msra.mxu1 %v790_v35  ;;  %v630_v1 = vsub.s32 0, %v629_v61 }
  0xf1   : > { %763 = vmatpush3.bf16.msra.mxu0 %v516_v34 }
  0xf2   : > { %v631_v3 = vrot.slane %v627_v0, %v630_v1  ;;  %v637_v5 = vrot.slane %v633_v2, %v630_v1 }
 0x1c2   : > { %v492_v19 = vpop.f32.mrb[4].mxu1 }
 0x1c3   : > { %v760_v20 = vpop.f32.mrb[5].mxu1  ;;  %v499_v21 = vsel %vm498_vm3, %v492_v19, -inf }
 0x1c4   : > { %500 = vmax.xlane.f32.xlu0 %v499_v21  ;;  %v495_v22 = vpop.f32.mrb[6].mxu1 }
 0x1c5   : > { %v761_v23 = vpop.f32.mrb[7].mxu1 }
 0x251   : > { %v501_v24 = vpop.xlane.xlu0 %500 }
 0x252   : > { %v502_v25 = vsub.f32 %v492_v19, %v501_v24 }
 0x254   : > { %v503_v26 = vmul.f32 1.442695, %v502_v25 }
 0x256   : > { %791 = vpow2.f32 %v503_v26 }
 0x260   : > { %v792_v27 = vpop.eup %791 }
 0x261   : > { %v505_v28 = vsel %vm498_vm3, %v792_v27, 0.0 }
 0x262   : > { %506 = vadd.xlane.f32.xlu0 %v505_v28 }
 0x2ef   : > { %v507_v36 = vpop.xlane.xlu0 %506 }
 0x2f0   : > { %793 = vrcp.f32 %v507_v36 }
 0x2fa   : > { %v794_v37 = vpop.eup %793 }
 0x2fb   : > { %v509_v38 = vmul.f32 %v794_v37, %v792_v27 }
 0x2fd   : > { %v510_v39 = vpack.c.bf16 %v509_v38, %v509_v38 }
 0x2ff   : > { %765 = vmatmul.mubr.msk.bf16.vlgmr.msra.gmra.mrb[8].mxu0 %vm498_vm3, %v510_v39 }
 0x3d2   : > { %v552_v40 = vpop.f32.mrb[8].mxu0 }
 0x3d3   : > { %v558_v41 = vpack.c.bf16 %v552_v40, %v552_v40  ;;  %v766_v42 = vpop.f32.mrb[9].mxu0 }
 0x3d4   : > { %v555_v43 = vpop.f32.mrb[10].mxu0 }
 0x3d5   : > { %v767_v44 = vpop.f32.mrb[11].mxu0  ;;  %771 = vmatmul.mubr.msk.bf16.vlgmr.msra.gmra.mrb[8].mxu1 %vm451_vm2, %v558_v41 }
 0x4a8   : > { %v605_v46 = vpop.f32.mrb[8].mxu1 }
 0x4a9   : > { %v606_v47 = vadd.f32 %v605_v46, %v561_v45  ;;  %v772_v48 = vpop.f32.mrb[9].mxu1 }
 0x4aa   : > { %v608_v49 = vpop.f32.mrb[10].mxu1 }
 0x4ab   : > { %v773_v50 = vpop.f32.mrb[11].mxu1  ;;  %v613_v51 = vsel %vm292_vm1, %v606_v47, 0.0 }
 0x4ac   : > { %614 = vadd.xlane.f32.xlu1 %v613_v51 }
 0x539   : > { %v615_v52 = vpop.xlane.xlu1 %614 }
 0x53a   : > { %v617_v53 = vmul.f32 0.03125, %v615_v52 }
 0x53c   : > { %v618_v54 = vsub.f32 %v606_v47, %v617_v53 }
 0x53e   : > { %v619_v55 = vmul.f32 %v618_v54, %v618_v54 }
 0x540   : > { %v620_v56 = vsel %vm292_vm1, %v619_v55, 0.0 }
 0x541   : > { %621 = vadd.xlane.f32.xlu1 %v620_v56 }
 0x5ce   : > { %v622_v57 = vpop.xlane.xlu1 %621 }
 0x5cf   : > { %v623_v58 = vmul.f32 0.03125, %v622_v57 }
 0x5d1   : > { %v624_v60 = vadd.f32 1e-06, %v623_v58 }
 0x5d3   : > { %795 = vrsqrt.f32 %v624_v60 }
 0x5dd   : > { %v796_v4 = vpop.eup %795 }
 0x5de   : > { %v626_v6 = vmul.f32 %v796_v4, %v618_v54 }
 0x5e0   : > { %v632_v7 = vmul.f32 %v631_v3, %v626_v6 }
 0x5e2   : > { %v638_v8 = vadd.f32 %v637_v5, %v632_v7 }
 0x5e4   : > { %v639_v9 = vpack.c.bf16 %v638_v8, %v638_v8 }
 0x5e6   : > { %641 = vst.msk [vmem:[%s273_s29] sm:$0xf] %vm640_vm5, %v639_v9 }
 0x5e7 PF: > { %s17_s24 = sadd.s32 1, %s803_s24  }
 0x5e8   : > { %p14_p4 = scmp.ge.s32.totalorder %s17_s24, 4  }
 0x5ea   :  { %16 = sbr.rel (!%p14_p4) target bundleno = 1 (0x1), region = 78 }

// kernel: transformer_encoder.15
= control target key start
LH: loop header
LB: loop body
LE: loop exit
PB: predicated region body
PF: predicated region fallthrough
CT: control target
= control target key end

     0   :  { %v252_v0 = vmov 0.0   ;;  %vm253_vm0 = vmmov 0   ;;  %vm52_vm1 = vcmask 261120   ;;  %v254_v4 = vmov 0.0|0.0   ;;  %s312_s1 = inlined_call_operand.vmem [shape: bf16[32,32], index: 1, kind: input, shape index: {}]   ;;  %s313_s0 = inlined_call_operand.vmem [shape: bf16[16,32], index: 0, kind: input, shape index: {}]   ;;  %s314_s4 = inlined_call_operand.<no memory space> [shape: bf16[1,1], index: 4, kind: input, shape index: {}]   ;;  %s315_s2 = inlined_call_operand.vmem [shape: bf16[1,32], index: 2, kind: input, shape index: {}]   ;;  %s316_s3 = inlined_call_operand.vmem [shape: bf16[1,32], index: 3, kind: input, shape index: {}]   ;;  %s317_s5 = inlined_call_operand.vmem [shape: f32[1,16], index: 5, kind: output, shape index: {}]  }
   0x1   :  { %220 = vmatprep.subr.bf16.mxu0 %v252_v0  ;;  %v245_v1 = vld [vmem:[%s312_s1] sm:$0xff]   ;;  %224 = vmatprep.mubr.msk.bf16.mxu0 %vm253_vm0, %v252_v0  ;;  %v246_v2 = vld [vmem:[%s312_s1 + $0x8] sm:$0xff]   ;;  %v255_v5 = vmov 0   ;;  %v10_v6 = vstv %s314_s4  ;;  %v31_v9 = vlaneseq  ;;  %vm237_vm2 = vmpackc.low %vm52_vm1, %vm52_vm1  ;;  %v256_v26 = vmov 269488144  }
   0x2   :  { %232 = vmatprep.mubr.msk.f32.mxu1 %vm253_vm0, %v252_v0  ;;  %221 = vmatpush3.bf16.msra.mxu0 %v245_v1  ;;  %v247_v3 = vld [vmem:[%s313_s0] sm:$0xff]   ;;  %11 = vst [vmem:[#allocation2] sm:$0x1] %v10_v6  ;;  %v109_v27 = vunpack.c.l.s4 %v256_v26  ;;  %vm200_vm3 = vcmask 122880  }
   0x3   :  { %222 = vmatprep.subr.bf16.mxu0 %v252_v0  ;;  %235 = vmatprep.subr.bf16.mxu1 %v254_v4  ;;  %v32_v10 = vshrl.u32 %v31_v9, 7  ;;  %v29_v11 = vld [vmem:[%s315_s2] sm:$0x1] }
   0x4   :  { %244 = vset.pattern.permute.xlu0 %v255_v5  ;;  %v30_v12 = vunpack.c.l.bf16 %v29_v11  ;;  %v99_v24 = vld [vmem:[%s316_s3] sm:$0x1]  ;;  %v110_v28 = vunpack.c.0.s8 %v109_v27 }
   0x5   :  { %v33_v13 = vsub.s32 0, %v32_v10  ;;  %v100_v25 = vunpack.c.l.bf16 %v99_v24 }
   0x6   :  { %223 = vmatpush3.bf16.msra.mxu0 %v246_v2  ;;  %v113_v29 = vsub.s32 %v110_v28, %v32_v10 }
   0x7   :  { %v34_v14 = vrot.slane %v30_v12, %v33_v13 }
   0x9   :  { %225 = vmatmul.mubr.msk.bf16.vlgmr.msra.gmra.mrb[0].mxu0 %vm52_vm1, %v247_v3  ;;  %v101_v7 = vld [vmem:[#allocation2] sm:$0x1] }
   0xa   :  { %v102_v8 = vunpack.c.l.bf16 %v101_v7 }
   0xc   :  { %105 = vperm.xlu0 %244, %v102_v8  }
  0x8b   :  { %v106_v30 = vpop.permute.xlu0 %105 }
  0x8c   :  { %v114_v31 = vrot.slane %v106_v30, %v113_v29 }
  0xdc   :  { %v90_v15 = vpop.f32.mrb[0].mxu0 }
  0xdd   :  { %v91_v16 = vadd.f32 %v90_v15, %v34_v14  ;;  %v226_v17 = vpop.f32.mrb[1].mxu0 }
  0xde   :  { %v93_v18 = vpop.f32.mrb[2].mxu0 }
  0xdf   :  { %v94_v19 = vadd.f32 %v93_v18, %v34_v14  ;;  %v227_v20 = vpop.f32.mrb[3].mxu0  ;;  %v97_v21 = vmax.f32 %v91_v16, 0.0 }
  0xe1   :  { %v98_v22 = vmax.f32 %v94_v19, 0.0 }
  0xe3   :  { %v236_v23 = vpack.c.bf16 %v98_v22, %v97_v21 }
  0xe5   :  { %238 = vmatpush3.bf16.xpose.msk.msra.mxu1 %vm237_vm2, %v236_v23 }
  0xec   :  { %233 = vmatmul.mubr.msk.f32.vlgmr.msra.gmra.mrb[0].mxu1 %vm52_vm1, %v100_v25 }
 0x1bf   :  { %v190_v32 = vpop.f32.mrb[0].mxu1 }
 0x1c0   :  { %v191_v33 = vadd.f32 %v190_v32, %v114_v31  ;;  %v234_v34 = vpop.f32.mrb[1].mxu1 }
 0x1c2   :  { %v213_v35 = vmul.f32 -1.442695, %v191_v33 }
 0x1c4   :  { %248 = vpow2.f32 %v213_v35 }
 0x1ce   :  { %v249_v36 = vpop.eup %248 }
 0x1cf   :  { %v197_v37 = vadd.f32 1.0, %v249_v36 }
 0x1d1   :  { %250 = vrcp.f32 %v197_v37 }
 0x1db   :  { %v251_v38 = vpop.eup %250 }
 0x1dc   :  { %201 = vst.msk [vmem:[%s317_s5] sm:$0x1] %vm200_vm3, %v251_v38 }

// kernel: transformer_encoder.10
= control target key start
LH: loop header
LB: loop body
LE: loop exit
PB: predicated region body
PF: predicated region fallthrough
CT: control target
= control target key end

     0   :  { %v304_v0 = vmov 0.0   ;;  %vm305_vm0 = vmmov 0   ;;  %vm56_vm1 = vcmask 261120   ;;  %v35_v8 = vlaneseq  ;;  %s390_s1 = inlined_call_operand.vmem [shape: bf16[32,64], index: 1, kind: input, shape index: {}]   ;;  %s391_s0 = inlined_call_operand.vmem [shape: bf16[16,32], index: 0, kind: input, shape index: {}]   ;;  %s392_s3 = inlined_call_operand.vmem [shape: bf16[64,32], index: 3, kind: input, shape index: {}]   ;;  %s393_s2 = inlined_call_operand.vmem [shape: bf16[1,64], index: 2, kind: input, shape index: {}]   ;;  %s394_s4 = inlined_call_operand.vmem [shape: bf16[1,32], index: 4, kind: input, shape index: {}]   ;;  %s395_s5 = inlined_call_operand.vmem [shape: bf16[1,32], index: 5, kind: input, shape index: {}]   ;;  %s396_s6 = inlined_call_operand.vmem [shape: bf16[1,32], index: 6, kind: input, shape index: {}]   ;;  %s397_s7 = inlined_call_operand.vmem [shape: bf16[16,32], index: 7, kind: output, shape index: {}]  }
   0x1   :  { %270 = vmatprep.subr.bf16.mxu0 %v304_v0  ;;  %v292_v1 = vld [vmem:[%s390_s1] sm:$0xff]   ;;  %274 = vmatprep.mubr.msk.bf16.mxu0 %vm305_vm0, %v304_v0  ;;  %v293_v2 = vld [vmem:[%s390_s1 + $0x8] sm:$0xff]   ;;  %v297_v6 = vld [vmem:[%s392_s3 + $0x10] sm:$0xff]   ;;  %vm142_vm2 = vcmask 523264   ;;  %vm242_vm3 = vcmask 257024  }
   0x2   :  { %278 = vmatprep.subr.bf16.mxu1 %v304_v0  ;;  %286 = vmatprep.mubr.msk.bf16.mxu1 %vm305_vm0, %v304_v0  ;;  %v27_v3 = vld [vmem:[%s391_s0] sm:$0xff]   ;;  %v296_v5 = vld [vmem:[%s392_s3 + $0x8] sm:$0xff]   ;;  %v298_v7 = vld [vmem:[%s392_s3 + $0x18] sm:$0xff]   ;;  %v36_v9 = vshrl.u32 %v35_v8, 7 }
   0x3   :  { %271 = vmatpush3.bf16.msra.mxu0 %v292_v1  ;;  %v295_v4 = vld [vmem:[%s392_s3] sm:$0xff]   ;;  %v187_v26 = vunpack.c.l.bf16 %v27_v3  ;;  %v188_v30 = vunpack.c.h.bf16 %v27_v3 }
   0x4   :  { %272 = vmatprep.subr.bf16.mxu0 %v304_v0  ;;  %279 = vmatpush3.bf16.msra.mxu1 %v295_v4  ;;  %v33_v10 = vld [vmem:[%s393_s2] sm:$0x1]  ;;  %v37_v12 = vsub.s32 0, %v36_v9 }
   0x5   :  { %280 = vmatprep.subr.bf16.mxu1 %v304_v0  ;;  %v34_v11 = vunpack.c.l.bf16 %v33_v10  ;;  %v112_v23 = vld [vmem:[%s394_s4] sm:$0x1] }
   0x6   :  { %v113_v24 = vunpack.c.l.bf16 %v112_v23  ;;  %v191_v53 = vld [vmem:[%s395_s5] sm:$0x1] }
   0x7   :  { %273 = vmatpush3.bf16.msra.mxu0 %v293_v2  ;;  %v38_v13 = vrot.slane %v34_v11, %v37_v12  ;;  %v192_v55 = vld [vmem:[%s396_s6] sm:$0x1]  ;;  %v220_v56 = vunpack.c.l.bf16 %v191_v53 }
   0x8   :  { %281 = vmatpush3.bf16.msra.mxu1 %v296_v5  ;;  %v117_v25 = vrot.slane %v113_v24, %v37_v12  ;;  %v227_v57 = vunpack.c.l.bf16 %v192_v55 }
   0x9   :  { %282 = vmatprep.subr.bf16.mxu1 %v304_v0  ;;  %v224_v58 = vrot.slane %v220_v56, %v37_v12 }
   0xa   :  { %275 = vmatmul.mubr.msk.bf16.vlgmr.msra.gmra.mrb[0].mxu0 %vm56_vm1, %v27_v3  ;;  %v231_v60 = vrot.slane %v227_v57, %v37_v12 }
   0xc   :  { %283 = vmatpush3.bf16.msra.mxu1 %v297_v6 }
   0xd   :  { %284 = vmatprep.subr.bf16.mxu1 %v304_v0 }
  0x10   :  { %285 = vmatpush3.bf16.msra.mxu1 %v298_v7 }
  0xdd   :  { %v94_v14 = vpop.f32.mrb[0].mxu0 }
  0xde   :  { %v95_v15 = vadd.f32 %v94_v14, %v38_v13  ;;  %v276_v16 = vpop.f32.mrb[1].mxu0 }
  0xdf   :  { %v97_v17 = vpop.f32.mrb[2].mxu0 }
  0xe0   :  { %v98_v18 = vadd.f32 %v97_v17, %v38_v13  ;;  %v277_v19 = vpop.f32.mrb[3].mxu0  ;;  %v101_v20 = vmax.f32 %v95_v15, 0.0 }
  0xe2   :  { %v102_v21 = vmax.f32 %v98_v18, 0.0 }
  0xe4   :  { %v103_v22 = vpack.c.bf16 %v102_v21, %v101_v20 }
  0xe6   :  { %287 = vmatmul.mubr.msk.bf16.vlgmr.msra.gmra.mrb[0].mxu1 %vm142_vm2, %v103_v22 }
 0x1b9   :  { %v180_v27 = vpop.f32.mrb[0].mxu1 }
 0x1ba   :  { %v181_v28 = vadd.f32 %v180_v27, %v117_v25  ;;  %v288_v29 = vpop.f32.mrb[1].mxu1 }
 0x1bb   :  { %v183_v31 = vpop.f32.mrb[2].mxu1 }
 0x1bc   :  { %v184_v32 = vadd.f32 %v183_v31, %v117_v25  ;;  %v289_v33 = vpop.f32.mrb[3].mxu1  ;;  %v189_v34 = vadd.f32 %v187_v26, %v181_v28 }
 0x1be   :  { %v193_v35 = vsel %vm56_vm1, %v189_v34, 0.0  ;;  %v190_v36 = vadd.f32 %v188_v30, %v184_v32 }
 0x1bf   :  { %194 = vadd.xlane.f32.xlu0 %v193_v35 }
 0x1c0   :  { %v196_v37 = vsel %vm56_vm1, %v190_v36, 0.0 }
 0x1c3   :  { %197 = vadd.xlane.f32.xlu0 %v196_v37 }
 0x24c   :  { %v195_v38 = vpop.xlane.xlu0 %194 }
 0x24d   :  { %v200_v39 = vmul.f32 0.03125, %v195_v38 }
 0x24f   :  { %v202_v40 = vsub.f32 %v189_v34, %v200_v39 }
 0x250   :  { %v198_v41 = vpop.xlane.xlu0 %197 }
 0x251   :  { %v201_v42 = vmul.f32 0.03125, %v198_v41  ;;  %v204_v43 = vmul.f32 %v202_v40, %v202_v40 }
 0x253   :  { %v203_v44 = vsub.f32 %v190_v36, %v201_v42  ;;  %v206_v45 = vsel %vm56_vm1, %v204_v43, 0.0 }
 0x254   :  { %207 = vadd.xlane.f32.xlu1 %v206_v45 }
 0x255   :  { %v205_v46 = vmul.f32 %v203_v44, %v203_v44 }
 0x257   :  { %v209_v47 = vsel %vm56_vm1, %v205_v46, 0.0 }
 0x258   :  { %210 = vadd.xlane.f32.xlu1 %v209_v47 }
 0x2e1   :  { %v208_v48 = vpop.xlane.xlu1 %207 }
 0x2e2   :  { %v212_v49 = vmul.f32 0.03125, %v208_v48 }
 0x2e4   :  { %v214_v50 = vadd.f32 1e-06, %v212_v49 }
 0x2e5   :  { %v211_v51 = vpop.xlane.xlu1 %210 }
 0x2e6   :  { %300 = vrsqrt.f32 %v214_v50  ;;  %v213_v52 = vmul.f32 0.03125, %v211_v51 }
 0x2e8   :  { %v215_v54 = vadd.f32 1e-06, %v213_v52 }
 0x2ea   :  { %302 = vrsqrt.f32 %v215_v54 }
 0x2f0   :  { %v301_v59 = vpop.eup %300 }
 0x2f1   :  { %v218_v61 = vmul.f32 %v301_v59, %v202_v40 }
 0x2f3   :  { %v225_v62 = vmul.f32 %v224_v58, %v218_v61 }
 0x2f4   :  { %v303_v63 = vpop.eup %302 }
 0x2f5   :  { %v232_v0 = vadd.f32 %v231_v60, %v225_v62  ;;  %v219_v1 = vmul.f32 %v303_v63, %v203_v44 }
 0x2f7   :  { %v260_v2 = vpack.c.bf16 %v232_v0, %v232_v0  ;;  %v226_v3 = vmul.f32 %v224_v58, %v219_v1 }
 0x2f9   :  { %243 = vst.msk [vmem:[%s397_s7] sm:$0xf] %vm242_vm3, %v260_v2  ;;  %v233_v4 = vadd.f32 %v231_v60, %v226_v3 }
 0x2fb   :  { %v261_v5 = vpack.c.bf16 %v233_v4, %v233_v4 }
 0x2fd   :  { %244 = vst.msk [vmem:[%s397_s7 + $0x4] sm:$0xf] %vm242_vm3, %v261_v5 }

// kernel: squeeze.1
= control target key start
LH: loop header
LB: loop body
LE: loop exit
PB: predicated region body
PF: predicated region fallthrough
CT: control target
= control target key end

     0   :  { %s85_s0 = inlined_call_operand.vmem [shape: f32[16], index: 0, kind: input, shape index: {}]   ;;  %s86_s1 = inlined_call_operand.hbm [shape: f32[2,8], index: 1, kind: output, shape index: {}]  }
   0x1   :  { %v5_v0 = vld [vmem:[%s85_s0] sm:$0x1] }
   0x2   :  { %2 = vsyncpa [#allocation1], 0  ;;  %6 = vst [vmem:[#allocation3] sm:$0x1] %v5_v0  ;;  %vm8_vm0 = vcmask 64512   ;;  %s58_s0 = smov 120  }
   0x3   :  { %s59_s8 = smov [#allocation0]  }
   0x4   :  { %s26_s9 = sshll.u32 %s59_s8, 4  ;;  %s27_s9 = int_to_ptr.vmem [resolvable:$true] %s26_s9 }
   0x5   :  { %s34_s10 = scalar_lea.vmem %s27_s9, 32  ;;  %p39_p1 = scmp.lt.s32.totalorder %s27_s9, %s27_s9 }
   0x6   :  { %p35_p0 = scmp.ne.s32.totalorder %s27_s9, %s34_s10  ;;  %p40_p2 = scmp.lt.s32.totalorder %s34_s10, %s34_s10 }
   0x8   :  { %p41_p3 = por %p40_p2, %p39_p1 }
   0x9   :  { %v10_v1 = vld [vmem:[#allocation3] sm:$0x1]  }
   0xa   :  { %v7_v2 = vld [vmem:[#allocation3] sm:$0x1]   ;;  %11 = vrot.lane.b32.xlu0 %v10_v1, %s58_s0  ;;  %p42_p4 = pnand %p41_p3, %p35_p0 }
   0xb   :  { %9 = vst.msk [vmem:[#allocation2] sm:$0x1] %vm8_vm0, %v7_v2  }
  0x7c   :  { %v12_v3 = vpop.permute.xlu0 %11  }
  0x7d   :  { %15 = vst.msk [vmem:[#allocation2 + $0x1] sm:$0x1] %vm8_vm0, %v12_v3  }
  0x84   :  { %v19_v4 = vld [vmem:[#allocation2] sm:$0x3] }
  0x85   :  { %21 = vst [vmem:[#allocation0] sm:$0x3] %v19_v4 }
  0x86   :  { %45 = shalt.err (!%p42_p4)
}
  0x87   :  { %s46_s13 = scalar_lea.hbm %s86_s1, 32 }
  0x88   :  { %p47_p5 = scmp.ne.s32.totalorder %s86_s1, %s46_s13  ;;  %p50_p6 = scmp.lt.u32.totalorder %s46_s13, %s86_s1 }
  0x8a   :  { %p52_p7 = pnand %p50_p6, %p47_p5 }
  0x8c   :  { %55 = shalt.err (!%p52_p7)
}
  0x8d   :  { %29 = dma.vmem_to_hbm [thread:$0]  %s27_s9, 32, %s86_s1, [#allocation1]  }
  0x8e   :  { %56 = dma.done.wait [#allocation1], 32  }
  0x8f   :  { %57 = vsyncadd [#allocation1], 4294967264 }
  0x90   :  { %31 = vsyncpa [#allocation1], 1 }

</bundles_post_ra>
